<compile_context>
chip_gen: v7x
topology: tpu7x:2x2x1
jax: 0.10.0
libtpu: 0.0.40
codegen_flags: <defaults>
</compile_context>

<pallas_src>
import functools

import jax
import jax.numpy as jnp
import numpy as np
from jax.experimental import pallas as pl
from jax.experimental.pallas import tpu as pltpu


def _round_up(x, m):
    return (x + m - 1) // m * m


def _supcon_kernel(alab_ref, clab_ref, anchor_ref, contrast_ref, loss_ref, *,
                   inv_temp, loss_scale, n_valid, a_valid):
    tile_a = anchor_ref.shape[0]
    n_pad = contrast_ref.shape[0]

    # Fold 1/temperature into the (TILE_A x D) anchor tile instead of dividing
    # the (TILE_A x N) logits.
    anchor = anchor_ref[...] * inv_temp                        # [TA, D]  f32
    contrast = contrast_ref[...]                               # [N_pad, D] f32

    # anchor @ contrast.T as an NT contraction -> MXU, no explicit transpose.
    logits0 = jax.lax.dot_general(
        anchor, contrast, (((1,), (1,)), ((), ())),
        preferred_element_type=jnp.float32)                    # [TA, N_pad]

    row0 = pl.program_id(0) * tile_a
    row_ids = jax.lax.broadcasted_iota(jnp.int32, (tile_a, n_pad), 0) + row0
    col_ids = jax.lax.broadcasted_iota(jnp.int32, (tile_a, n_pad), 1)

    col_valid = col_ids < n_valid                              # real contrast cols
    lmask = jnp.logical_and(col_valid, row_ids != col_ids)     # drop self-contrast
    pmask = jnp.logical_and(alab_ref[...] == clab_ref[...], lmask)  # positives
    pmask_f = pmask.astype(jnp.float32)

    # Numerical stability: per-row max over real columns (incl. self, as in torch).
    neg_inf = jnp.float32(-jnp.inf)
    row_max = jnp.max(jnp.where(col_valid, logits0, neg_inf),
                      axis=1, keepdims=True)                   # [TA, 1]
    logits = logits0 - row_max                                 # finite everywhere

    # log-sum-exp over non-self real columns (exp(-inf) == 0 for masked cols).
    exp_logits = jnp.exp(jnp.where(lmask, logits, neg_inf))
    lse = jnp.log(jnp.sum(exp_logits, axis=1, keepdims=True))  # [TA, 1]

    # mean over positives of log_prob = logits - lse, WITHOUT materializing it.
    cnt = jnp.sum(pmask_f, axis=1, keepdims=True)              # [TA, 1]
    s_pos = jnp.sum(pmask_f * logits, axis=1, keepdims=True)   # [TA, 1]
    cnt_safe = jnp.where(cnt < 1e-6, 1.0, cnt)
    mean_log_prob_pos = (s_pos - cnt * lse) / cnt_safe

    loss_col = -loss_scale * mean_log_prob_pos                 # [TA, 1]

    # Zero the contributions of padded anchor rows.
    row_valid = (jax.lax.broadcasted_iota(jnp.int32, (tile_a, 1), 0) + row0) < a_valid
    loss_ref[...] = jnp.where(row_valid, loss_col, 0.0)


def supcon_loss(features, labels=None, *, temperature=0.07,
                contrast_mode='all', base_temperature=0.07):
    """Pallas implementation of SupConLoss.forward."""
    if features.ndim < 3:
        raise ValueError('`features` needs to be [bsz, n_views, ...]')
    bsz, n_views = features.shape[0], features.shape[1]
    features = features.reshape(bsz, n_views, -1).astype(jnp.float32)
    dim = features.shape[-1]

    # Labels (unsupervised case == unique label per sample -> eye mask).
    if labels is None:
        labels_vec = jnp.arange(bsz, dtype=jnp.int32)
    else:
        labels_vec = jnp.asarray(labels).reshape(-1).astype(jnp.int32)
        if labels_vec.shape[0] != bsz:
            raise ValueError('Num of labels does not match num of features')

    contrast_count = n_views
    # torch.cat(torch.unbind(features, dim=1), dim=0): view-major ordering
    contrast_feature = jnp.transpose(features, (1, 0, 2)).reshape(n_views * bsz, dim)
    contrast_labels = jnp.tile(labels_vec, contrast_count)

    if contrast_mode == 'one':
        anchor_feature = features[:, 0]
        anchor_count = 1
    elif contrast_mode == 'all':
        anchor_feature = contrast_feature
        anchor_count = contrast_count
    else:
        raise ValueError(f'Unknown mode: {contrast_mode}')
    anchor_labels = jnp.tile(labels_vec, anchor_count)

    A = anchor_count * bsz
    N = contrast_count * bsz

    # ---- pad to TPU-friendly shapes ---------------------------------------
    if A >= 512:
        tile_a = 256          # 256-aligned for v6e/v7x MXU
    elif A >= 128:
        tile_a = 128          # 128 is enough for v5e
    else:
        tile_a = _round_up(A, 8)
    a_pad = _round_up(A, tile_a)
    n_pad = _round_up(N, 128)
    d_pad = _round_up(dim, 128)

    anchor_p = jnp.zeros((a_pad, d_pad), jnp.float32).at[:A, :dim].set(anchor_feature)
    contrast_p = jnp.zeros((n_pad, d_pad), jnp.float32).at[:N, :dim].set(contrast_feature)
    alab_p = jnp.full((a_pad, 1), -1, jnp.int32).at[:A, 0].set(anchor_labels)
    clab_p = jnp.full((1, n_pad), -2, jnp.int32).at[0, :N].set(contrast_labels)

    num_tiles = a_pad // tile_a

    kernel = functools.partial(
        _supcon_kernel,
        inv_temp=float(1.0 / temperature),
        loss_scale=float(temperature / base_temperature),
        n_valid=int(N),
        a_valid=int(A))

    per_row = pl.pallas_call(
        kernel,
        out_shape=jax.ShapeDtypeStruct((a_pad, 1), jnp.float32),
        grid=(num_tiles,),
        in_specs=[
            pl.BlockSpec((tile_a, 1), lambda i: (i, 0)),       # anchor labels tile
            pl.BlockSpec((1, n_pad), lambda i: (0, 0)),        # contrast labels
            pl.BlockSpec((tile_a, d_pad), lambda i: (i, 0)),   # anchor feature tile
            pl.BlockSpec((n_pad, d_pad), lambda i: (0, 0)),    # contrast (resident)
        ],
        out_specs=pl.BlockSpec((tile_a, 1), lambda i: (i, 0)),
        compiler_params=pltpu.CompilerParams(
            dimension_semantics=("parallel",)),
    )(alab_p, clab_p, anchor_p, contrast_p)

    # Padded rows were zeroed in-kernel; mean over the A real anchor rows
    # (== loss.view(anchor_count, batch_size).mean() in the reference).
    return jnp.sum(per_row) / A


def _numpy_reference(features, labels, temperature=0.07, base_temperature=0.07):
    """Pure-numpy transcription of the PyTorch forward (contrast_mode='all')."""
    f = np.asarray(features, dtype=np.float64)
    bsz, n_views, dim = f.shape
    if labels is None:
        base_mask = np.eye(bsz)
    else:
        lab = np.asarray(labels).reshape(-1, 1)
        base_mask = (lab == lab.T).astype(np.float64)
    contrast = np.concatenate([f[:, v] for v in range(n_views)], axis=0)
    anchor = contrast
    adc = anchor @ contrast.T / temperature
    logits = adc - adc.max(axis=1, keepdims=True)
    mask = np.tile(base_mask, (n_views, n_views))
    lmask = 1.0 - np.eye(bsz * n_views)
    mask = mask * lmask
    exp_logits = np.exp(logits) * lmask
    log_prob = logits - np.log(exp_logits.sum(1, keepdims=True))
    pos = mask.sum(1)
    pos = np.where(pos < 1e-6, 1.0, pos)
    mlpp = (mask * log_prob).sum(1) / pos
    return (-(temperature / base_temperature) * mlpp).mean()


if __name__ == "__main__":
    key = jax.random.PRNGKey(0)
    k1, k2, k3, k4 = jax.random.split(key, 4)

    # Case 1: canonical small shape (single row tile).
    bsz, n_views, dim = 8, 2, 32
    feats = jax.random.normal(k1, (bsz, n_views, dim), dtype=jnp.float32)
    feats = feats / jnp.linalg.norm(feats, axis=-1, keepdims=True)
    labels = jax.random.randint(k2, (bsz,), 0, 4)

    loss_sup = jax.block_until_ready(supcon_loss(feats, labels))       # supervised
    loss_unsup = jax.block_until_ready(supcon_loss(feats, None))       # SimCLR

    ref_sup = _numpy_reference(np.asarray(feats), np.asarray(labels))
    ref_unsup = _numpy_reference(np.asarray(feats), None)
    assert np.allclose(float(loss_sup), ref_sup, rtol=1e-3, atol=1e-3), \
        (float(loss_sup), ref_sup)
    assert np.allclose(float(loss_unsup), ref_unsup, rtol=1e-3, atol=1e-3), \
        (float(loss_unsup), ref_unsup)

    # Case 2: exercises multi-tile grid ("parallel" axis) and row/col padding
    # (A = N = 144 -> tile 128, padded to 256).
    bsz2, n_views2, dim2 = 72, 2, 48
    feats2 = jax.random.normal(k3, (bsz2, n_views2, dim2), dtype=jnp.float32)
    feats2 = feats2 / jnp.linalg.norm(feats2, axis=-1, keepdims=True)
    labels2 = jax.random.randint(k4, (bsz2,), 0, 10)
    loss2 = jax.block_until_ready(supcon_loss(feats2, labels2))
    ref2 = _numpy_reference(np.asarray(feats2), np.asarray(labels2))
    assert np.allclose(float(loss2), ref2, rtol=1e-3, atol=1e-3), (float(loss2), ref2)

    print("KERNEL_OK")
</pallas_src>

<mosaic_0001>
module attributes {stable_mosaic.version = 11 : i64} {
  func.func @_supcon_kernel(%arg0: i32, %arg1: memref<16x1xi32, #tpu.memory_space<vmem>>, %arg2: memref<1x128xi32, #tpu.memory_space<vmem>>, %arg3: memref<16x128xf32, #tpu.memory_space<vmem>>, %arg4: memref<128x128xf32, #tpu.memory_space<vmem>>, %arg5: memref<16x1xf32, #tpu.memory_space<vmem>>) attributes {dimension_semantics = [#tpu.dimension_semantics<parallel>], iteration_bounds = array<i64: 1>, scalar_prefetch = 0 : i64, scratch_operands = 0 : i64, tpu.core_type = #tpu.core_type<tc>, window_params = [{transform_indices = @transform_0, window_bounds = array<i64: 16, 1>}, {pipeline_mode = #tpu.pipeline_mode<synchronous>, transform_indices = @transform_1, window_bounds = array<i64: 1, 128>}, {transform_indices = @transform_2, window_bounds = array<i64: 16, 128>}, {pipeline_mode = #tpu.pipeline_mode<synchronous>, transform_indices = @transform_3, window_bounds = array<i64: 128, 128>}, {transform_indices = @transform_4, window_bounds = array<i64: 16, 1>}]} {
    %c0 = arith.constant 0 : index
    %c0_0 = arith.constant 0 : index
    %0 = vector.load %arg3[%c0, %c0_0] : memref<16x128xf32, #tpu.memory_space<vmem>>, vector<16x128xf32>
    %cst = arith.constant 14.2857141 : f32
    %1 = vector.broadcast %cst : f32 to vector<16x128xf32>
    %2 = arith.mulf %0, %1 : vector<16x128xf32>
    %c0_1 = arith.constant 0 : index
    %c0_2 = arith.constant 0 : index
    %3 = vector.load %arg4[%c0_1, %c0_2] : memref<128x128xf32, #tpu.memory_space<vmem>>, vector<128x128xf32>
    %cst_3 = arith.constant dense<0.000000e+00> : vector<16x128xf32>
    %4 = tpu.matmul %2, %3, %cst_3 {dimension_numbers = #tpu.dot_dimension_numbers<[1], [1], [0], [0], [0, 0, 1, 0], [], []>} : vector<16x128xf32>, vector<128x128xf32>, vector<16x128xf32> -> vector<16x128xf32>
    %c16_i32 = arith.constant 16 : i32
    %5 = arith.muli %arg0, %c16_i32 : i32
    %6 = tpu.iota {dimensions = array<i32: 0>} : vector<16x128xi32>
    %7 = vector.broadcast %5 : i32 to vector<16x128xi32>
    %8 = arith.addi %6, %7 : vector<16x128xi32>
    %9 = tpu.iota {dimensions = array<i32: 1>} : vector<16x128xi32>
    %c16_i32_4 = arith.constant 16 : i32
    %10 = vector.broadcast %c16_i32_4 : i32 to vector<16x128xi32>
    %11 = arith.cmpi slt, %9, %10 : vector<16x128xi32>
    %12 = arith.cmpi ne, %8, %9 : vector<16x128xi32>
    %13 = arith.andi %11, %12 : vector<16x128xi1>
    %c0_5 = arith.constant 0 : index
    %c0_6 = arith.constant 0 : index
    %14 = vector.load %arg1[%c0_5, %c0_6] : memref<16x1xi32, #tpu.memory_space<vmem>>, vector<16x1xi32>
    %c0_7 = arith.constant 0 : index
    %c0_8 = arith.constant 0 : index
    %15 = vector.load %arg2[%c0_7, %c0_8] : memref<1x128xi32, #tpu.memory_space<vmem>>, vector<1x128xi32>
    %16 = vector.broadcast %14 : vector<16x1xi32> to vector<16x128xi32>
    %17 = vector.broadcast %15 : vector<1x128xi32> to vector<16x128xi32>
    %18 = arith.cmpi eq, %16, %17 : vector<16x128xi32>
    %19 = arith.andi %18, %13 : vector<16x128xi1>
    %20 = arith.extui %19 : vector<16x128xi1> to vector<16x128xi32>
    %21 = arith.sitofp %20 : vector<16x128xi32> to vector<16x128xf32>
    %cst_9 = arith.constant 0xFF800000 : f32
    %22 = vector.broadcast %cst_9 : f32 to vector<16x128xf32>
    %23 = arith.select %11, %4, %22 : vector<16x128xi1>, vector<16x128xf32>
    %cst_10 = arith.constant dense<0xFF800000> : vector<16xf32>
    %24 = vector.multi_reduction <maximumf>, %23, %cst_10 [1] : vector<16x128xf32> to vector<16xf32>
    %25 = vector.shape_cast %24 : vector<16xf32> to vector<16x1xf32>
    %26 = vector.broadcast %25 : vector<16x1xf32> to vector<16x128xf32>
    %27 = arith.subf %4, %26 : vector<16x128xf32>
    %cst_11 = arith.constant 0xFF800000 : f32
    %28 = vector.broadcast %cst_11 : f32 to vector<16x128xf32>
    %29 = arith.select %13, %27, %28 : vector<16x128xi1>, vector<16x128xf32>
    %30 = math.exp %29 : vector<16x128xf32>
    %cst_12 = arith.constant dense<0.000000e+00> : vector<16xf32>
    %31 = vector.multi_reduction <add>, %30, %cst_12 [1] : vector<16x128xf32> to vector<16xf32>
    %32 = vector.shape_cast %31 : vector<16xf32> to vector<16x1xf32>
    %33 = math.log %32 : vector<16x1xf32>
    %cst_13 = arith.constant dense<0.000000e+00> : vector<16xf32>
    %34 = vector.multi_reduction <add>, %21, %cst_13 [1] : vector<16x128xf32> to vector<16xf32>
    %35 = vector.shape_cast %34 : vector<16xf32> to vector<16x1xf32>
    %36 = arith.mulf %21, %27 : vector<16x128xf32>
    %cst_14 = arith.constant dense<0.000000e+00> : vector<16xf32>
    %37 = vector.multi_reduction <add>, %36, %cst_14 [1] : vector<16x128xf32> to vector<16xf32>
    %38 = vector.shape_cast %37 : vector<16xf32> to vector<16x1xf32>
    %cst_15 = arith.constant 9.99999997E-7 : f32
    %39 = vector.broadcast %cst_15 : f32 to vector<16x1xf32>
    %40 = arith.cmpf olt, %35, %39 : vector<16x1xf32>
    %cst_16 = arith.constant 1.000000e+00 : f32
    %41 = vector.broadcast %cst_16 : f32 to vector<16x1xf32>
    %42 = arith.select %40, %41, %35 : vector<16x1xi1>, vector<16x1xf32>
    %43 = arith.mulf %35, %33 : vector<16x1xf32>
    %44 = arith.subf %38, %43 : vector<16x1xf32>
    %45 = arith.divf %44, %42 : vector<16x1xf32>
    %cst_17 = arith.constant -1.000000e+00 : f32
    %46 = vector.broadcast %cst_17 : f32 to vector<16x1xf32>
    %47 = arith.mulf %46, %45 : vector<16x1xf32>
    %48 = tpu.iota {dimensions = array<i32: 0>} : vector<16x1xi32>
    %49 = vector.broadcast %5 : i32 to vector<16x1xi32>
    %50 = arith.addi %48, %49 : vector<16x1xi32>
    %c16_i32_18 = arith.constant 16 : i32
    %51 = vector.broadcast %c16_i32_18 : i32 to vector<16x1xi32>
    %52 = arith.cmpi slt, %50, %51 : vector<16x1xi32>
    %cst_19 = arith.constant 0.000000e+00 : f32
    %53 = vector.broadcast %cst_19 : f32 to vector<16x1xf32>
    %54 = arith.select %52, %47, %53 : vector<16x1xi1>, vector<16x1xf32>
    %c0_20 = arith.constant 0 : index
    %c0_21 = arith.constant 0 : index
    %55 = vector.load %arg5[%c0_20, %c0_21] : memref<16x1xf32, #tpu.memory_space<vmem>>, vector<16x1xf32>
    tpu.vector_store %arg5[%c0_20, %c0_21], %54 {strides = array<i32>} : memref<16x1xf32, #tpu.memory_space<vmem>>, vector<16x1xf32>,
    return
  }
  func.func @transform_0(%arg0: i32) -> (i32, i32) {
    %c0_i32 = arith.constant 0 : i32
    %c0_i32_0 = arith.constant 0 : i32
    return %arg0, %c0_i32 : i32, i32
  }
  func.func @transform_1(%arg0: i32) -> (i32, i32) {
    %c0_i32 = arith.constant 0 : i32
    %c0_i32_0 = arith.constant 0 : i32
    %c0_i32_1 = arith.constant 0 : i32
    return %c0_i32, %c0_i32_0 : i32, i32
  }
  func.func @transform_2(%arg0: i32) -> (i32, i32) {
    %c0_i32 = arith.constant 0 : i32
    %c0_i32_0 = arith.constant 0 : i32
    return %arg0, %c0_i32 : i32, i32
  }
  func.func @transform_3(%arg0: i32) -> (i32, i32) {
    %c0_i32 = arith.constant 0 : i32
    %c0_i32_0 = arith.constant 0 : i32
    %c0_i32_1 = arith.constant 0 : i32
    return %c0_i32, %c0_i32_0 : i32, i32
  }
  func.func @transform_4(%arg0: i32) -> (i32, i32) {
    %c0_i32 = arith.constant 0 : i32
    %c0_i32_0 = arith.constant 0 : i32
    return %arg0, %c0_i32 : i32, i32
  }
}

</mosaic_0001>

<bundles_post_ra>
// kernel: tpu_custom_call.1
= control target key start
LH: loop header
LB: loop body
LE: loop exit
PB: predicated region body
PF: predicated region fallthrough
CT: control target
= control target key end

     0   :  { %9 = vsyncpa [#allocation3], 0  ;;  %s350_s15 = smov [#allocation2]   ;;  %s417_s0 = inlined_call_operand.vmem [shape: s32[16,1], index: 0, kind: input, shape index: {}]   ;;  %s418_s1 = inlined_call_operand.vmem [shape: s32[1,128], index: 1, kind: input, shape index: {}]   ;;  %s419_s2 = inlined_call_operand.vmem [shape: f32[16,128], index: 2, kind: input, shape index: {}]   ;;  %s420_s3 = inlined_call_operand.hbm [shape: f32[128,128], index: 3, kind: input, shape index: {}]   ;;  %s421_s4 = inlined_call_operand.vmem [shape: f32[16,1], index: 4, kind: output, shape index: {}]  }
   0x1   :  { %s21_s16 = sshll.u32 %s350_s15, 4  ;;  %s326_s19 = scalar_lea.hbm %s420_s3, 2048  ;;  %s22_s16 = int_to_ptr.vmem [resolvable:$true] %s21_s16 }
   0x2   :  { %p327_p0 = scmp.ne.s32.totalorder %s420_s3, %s326_s19  ;;  %p330_p1 = scmp.lt.u32.totalorder %s326_s19, %s420_s3 }
   0x4   :  { %p332_p2 = pnand %p330_p1, %p327_p0 }
   0x6   :  { %335 = shalt.err (!%p332_p2)
}
   0x7   :  { %s336_s24 = scalar_lea.vmem %s22_s16, 2048  ;;  %p341_p4 = scmp.lt.s32.totalorder %s22_s16, %s22_s16 }
   0x8   :  { %p337_p3 = scmp.ne.s32.totalorder %s22_s16, %s336_s24  ;;  %p342_p5 = scmp.lt.s32.totalorder %s336_s24, %s336_s24 }
   0xa   :  { %p343_p6 = por %p342_p5, %p341_p4 }
   0xc   :  { %p344_p7 = pnand %p343_p6, %p337_p3 }
   0xe   :  { %347 = shalt.err (!%p344_p7)
}
   0xf   :  { %s351_s25 = smov 128   ;;  %s352_s26 = smov 8  }
  0x10   :  { %27 = dma.hbm_to_vmem [thread:$0]  %s420_s3, 2048, %s22_s16, [#allocation3], %s351_s25, %s351_s25, %s352_s26  }
  0x11   :  { %348 = dma.done.wait [#allocation3], 2048  }
  0x12   :  { %349 = vsyncadd [#allocation3], 4294965248  ;;  %v35_v0 = vld [vmem:[#allocation2] sm:$0xff]  ;;  %v36_v1 = vld [vmem:[#allocation2 + $0x8] sm:$0xff]  ;;  %v353_v29 = vmov 0   ;;  %v127_v31 = vlaneseq  ;;  %v354_v41 = vmov 0.0  }
  0x13   :  { %v37_v2 = vld [vmem:[#allocation2 + $0x10] sm:$0xff]  ;;  %v275_v3 = vpack.c.bf16 %v36_v1, %v35_v0  ;;  %v38_v4 = vld [vmem:[#allocation2 + $0x18] sm:$0xff]  ;;  %v39_v7 = vld [vmem:[#allocation2 + $0x20] sm:$0xff]  ;;  %312 = vset.pattern.permute.xlu1 %v353_v29  ;;  %313 = vset.pattern.permute.xlu0 %v353_v29  ;;  %vm211_vm11 = vcmask 7168  }
  0x14   :  { %v279_v5 = vpack.c.bf16 %v38_v4, %v37_v2  ;;  %v31_v6 = vld [vmem:[%s419_s2] sm:$0xff]  ;;  %v40_v8 = vld [vmem:[#allocation2 + $0x28] sm:$0xff]  ;;  %v42_v12 = vld [vmem:[#allocation2 + $0x38] sm:$0xff]  ;;  %v134_v32 = vand.u32 127, %v127_v31  ;;  %v128_v37 = vshrl.u32 %v127_v31, 7 }
  0x15   :  { %276 = vmatprep.subr.bf16.mxu0 %v275_v3  ;;  %v33_v9 = vmul.f32 14.285714, %v31_v6  ;;  %v283_v10 = vpack.c.bf16 %v40_v8, %v39_v7  ;;  %v41_v11 = vld [vmem:[#allocation2 + $0x30] sm:$0xff]  ;;  %v43_v14 = vld [vmem:[#allocation2 + $0x40] sm:$0xff]  ;;  %v44_v15 = vld [vmem:[#allocation2 + $0x48] sm:$0xff] }
  0x16   :  { %278 = vmatpush3.bf16.xpose.msra.mxu0 %v275_v3  ;;  %v287_v13 = vpack.c.bf16 %v42_v12, %v41_v11  ;;  %v291_v16 = vpack.c.bf16 %v44_v15, %v43_v14  ;;  %v45_v17 = vld [vmem:[#allocation2 + $0x50] sm:$0xff]  ;;  %v46_v18 = vld [vmem:[#allocation2 + $0x58] sm:$0xff]  ;;  %v47_v20 = vld [vmem:[#allocation2 + $0x60] sm:$0xff]  ;;  %vm135_vm0 = vcmp.lt.s32.totalorder %v134_v32, 16  ;;  %vm136_vm1 = vcmp.ne.s32.totalorder %v128_v37, %v134_v32 }
  0x17   :  { %280 = vmatprep.subr.bf16.mxu0 %v279_v5  ;;  %272 = vmatprep.mubr.f32.mxu0 %v33_v9  ;;  %v295_v19 = vpack.c.bf16 %v46_v18, %v45_v17  ;;  %v48_v21 = vld [vmem:[#allocation2 + $0x68] sm:$0xff]  ;;  %v49_v23 = vld [vmem:[#allocation2 + $0x70] sm:$0xff]  ;;  %v50_v24 = vld [vmem:[#allocation2 + $0x78] sm:$0xff]  ;;  %v129_v40 = vadd.s32 8, %v128_v37 }
  0x18   :  { %v299_v22 = vpack.c.bf16 %v48_v21, %v47_v20  ;;  %v303_v25 = vpack.c.bf16 %v50_v24, %v49_v23  ;;  %v32_v26 = vld [vmem:[%s419_s2 + $0x8] sm:$0xff]  ;;  %v140_v28 = vld [vmem:[%s417_s0] sm:$0xff]  ;;  %vm138_vm3 = vmand %vm135_vm0, %vm136_vm1 }
  0x19   :  { %v34_v27 = vmul.f32 14.285714, %v32_v26  ;;  %144 = vperm.xlu1 %312, %v140_v28   ;;  %v141_v30 = vld [vmem:[%s417_s0 + $0x8] sm:$0xff]  ;;  %v219_v38 = vld [vmem:[%s418_s1] ss:$0 sm:$0xff]  ;;  %vm137_vm5 = vcmp.ne.s32.totalorder %v129_v40, %v134_v32 }
  0x1a   :  { %vm139_vm7 = vmand %vm135_vm0, %vm137_vm5 }
  0x1d   :  { %147 = vperm.xlu1 %312, %v141_v30  }
  0x1e   :  { %282 = vmatpush3.bf16.xpose.msra.mxu0 %v279_v5 }
  0x1f   :  { %284 = vmatprep.subr.bf16.mxu0 %v283_v10 }
  0x26   :  { %286 = vmatpush3.bf16.xpose.msra.mxu0 %v283_v10 }
  0x27   :  { %288 = vmatprep.subr.bf16.mxu0 %v287_v13 }
  0x2e   :  { %290 = vmatpush3.bf16.xpose.msra.mxu0 %v287_v13 }
  0x2f   :  { %292 = vmatprep.subr.bf16.mxu0 %v291_v16 }
  0x36   :  { %294 = vmatpush3.bf16.xpose.msra.mxu0 %v291_v16 }
  0x37   :  { %296 = vmatprep.subr.bf16.mxu0 %v295_v19 }
  0x3e   :  { %298 = vmatpush3.bf16.xpose.msra.mxu0 %v295_v19 }
  0x3f   :  { %300 = vmatprep.subr.bf16.mxu0 %v299_v22 }
  0x46   :  { %302 = vmatpush3.bf16.xpose.msra.mxu0 %v299_v22 }
  0x47   :  { %304 = vmatprep.subr.bf16.mxu0 %v303_v25 }
  0x4e   :  { %306 = vmatpush3.bf16.xpose.msra.mxu0 %v303_v25 }
  0x55   :  { %273 = vmatmul.mubr.f32.vlgmr.msra.gmra.mrb[0].mxu0 %v34_v27 }
  0x98   :  { %v145_v39 = vpop.permute.xlu1 %144 }
  0x99   :  { %vm153_vm2 = vcmp.eq.s32.totalorder %v145_v39, %v219_v38 }
  0x9a   :  { %vm155_vm4 = vmand %vm153_vm2, %vm138_vm3 }
  0x9b   :  { %v220_v42 = vsel %vm155_vm4, 1.0, %v354_v41 }
  0x9c   :  { %v148_v43 = vpop.permute.xlu1 %147 }
  0x9d   :  { %vm154_vm6 = vcmp.eq.s32.totalorder %v148_v43, %v219_v38 }
  0x9e   :  { %vm156_vm8 = vmand %vm154_vm6, %vm139_vm7 }
  0x9f   :  { %v221_v44 = vsel %vm156_vm8, 1.0, %v354_v41 }
 0x128   :  { %v274_v33 = vpop.f32.mrb[0].mxu0 }
 0x129   :  { %v117_v34 = vpop.f32.mrb[1].mxu0  ;;  %v162_v36 = vsel %vm135_vm0, %v274_v33, -inf }
 0x12a   :  { %v161_v35 = vsel %vm135_vm0, %v117_v34, -inf }
 0x12b   :  { %163 = vmax.xlane.f32.xlu0 %v161_v35 }
 0x12f   :  { %165 = vmax.xlane.f32.xlu0 %v162_v36 }
 0x133   :  { %183 = vadd.xlane.f32.xlu0 %v220_v42 }
 0x1b8   :  { %v164_v45 = vpop.xlane.xlu0 %163 }
 0x1b9   :  { %v167_v46 = vsub.f32 %v117_v34, %v164_v45 }
 0x1bb   :  { %v169_v47 = vsel %vm138_vm3, %v167_v46, -inf  ;;  %v187_v56 = vmul.f32 %v220_v42, %v167_v46 }
 0x1bc   :  { %v171_v48 = vmul.f32 1.442695, %v169_v47  ;;  %v166_v49 = vpop.xlane.xlu0 %165 }
 0x1bd   :  { %v168_v50 = vsub.f32 %v274_v33, %v166_v49 }
 0x1be   :  { %314 = vpow2.f32 %v171_v48 }
 0x1bf   :  { %v170_v51 = vsel %vm139_vm7, %v168_v50, -inf  ;;  %v188_v52 = vmul.f32 %v221_v44, %v168_v50 }
 0x1c0   :  { %v173_v53 = vmul.f32 1.442695, %v170_v51  ;;  %v184_v57 = vpop.xlane.xlu0 %183 }
 0x1c1   :  { %vm193_vm9 = vcmp.lt.f32.partialorder %v184_v57, 1e-06 }
 0x1c2   :  { %316 = vpow2.f32 %v173_v53  ;;  %v195_v59 = vsel %vm193_vm9, 1.0, %v184_v57 }
 0x1c8   :  { %v315_v54 = vpop.eup %314 }
 0x1c9   :  { %175 = vadd.xlane.f32.xlu0 %v315_v54 }
 0x1cc   :  { %v317_v55 = vpop.eup %316 }
 0x1cd   :  { %185 = vadd.xlane.f32.xlu0 %v221_v44  ;;  %177 = vadd.xlane.f32.xlu1 %v317_v55 }
 0x1d1   :  { %189 = vadd.xlane.f32.xlu0 %v187_v56 }
 0x1d5   :  { %191 = vadd.xlane.f32.xlu0 %v188_v52 }
 0x256   :  { %v176_v58 = vpop.xlane.xlu0 %175 }
 0x257   :  { %318 = vlog2.f32 %v176_v58 }
 0x25a   :  { %v178_v60 = vpop.xlane.xlu1 %177  ;;  %v186_v61 = vpop.xlane.xlu0 %185 }
 0x25b   :  { %320 = vlog2.f32 %v178_v60  ;;  %vm194_vm10 = vcmp.lt.f32.partialorder %v186_v61, 1e-06 }
 0x25c   :  { %322 = vrcp.f32 %v195_v59  ;;  %v196_v62 = vsel %vm194_vm10, 1.0, %v186_v61 }
 0x25d   :  { %324 = vrcp.f32 %v196_v62 }
 0x25e   :  { %v190_v1 = vpop.xlane.xlu0 %189 }
 0x261   :  { %v319_v63 = vpop.eup %318 }
 0x262   :  { %v180_v0 = vmul.f32 0.6931472, %v319_v63  ;;  %v192_v9 = vpop.xlane.xlu0 %191 }
 0x264   :  { %v197_v2 = vmul.f32 %v184_v57, %v180_v0 }
 0x265   :  { %v321_v3 = vpop.eup %320 }
 0x266   :  { %v182_v4 = vmul.f32 0.6931472, %v321_v3  ;;  %v199_v5 = vsub.f32 %v190_v1, %v197_v2  ;;  %v323_v6 = vpop.eup %322 }
 0x267   :  { %v325_v12 = vpop.eup %324 }
 0x268   :  { %v202_v7 = vmul.f32 %v323_v6, %v199_v5  ;;  %v198_v8 = vmul.f32 %v186_v61, %v182_v4 }
 0x26a   :  { %v205_v10 = vmul.f32 -1.0, %v202_v7  ;;  %v200_v11 = vsub.f32 %v192_v9, %v198_v8 }
 0x26c   :  { %212 = vst.msk [vmem:[%s421_s4] sm:$0xff] %vm211_vm11, %v205_v10  ;;  %v204_v13 = vmul.f32 %v325_v12, %v200_v11 }
 0x26e   :  { %v206_v14 = vmul.f32 -1.0, %v204_v13 }
 0x270   :  { %213 = vst.msk [vmem:[%s421_s4 + $0x8] sm:$0xff] %vm211_vm11, %v206_v14 }
 0x271   :  { %218 = vsyncpa [#allocation3], 1 }

</bundles_post_ra>
